<compile_context>
chip_gen: v6e
topology: v6e:2x2x1
jax: 0.10.0
libtpu: 0.0.40
codegen_flags: <defaults>
</compile_context>

<pallas_src>
import jax
import jax.numpy as jnp
from jax.experimental import pallas as pl
from jax.experimental.pallas import tpu as pltpu


# ----------------------------------------------------------------------------
# Helpers
# ----------------------------------------------------------------------------
def _round_up(x, m):
    return (x + m - 1) // m * m


def _prep_fused_weights(params, H, Hp, Ip, compute_dtype):
    """Build W=(Ip+Hp, 4*Hp) = [W_ih^T ; W_hh^T] (gate-blocked, zero padded)
    and b=(1, 4*Hp) = b_ih + b_hh (gate-blocked, zero padded, f32)."""
    wih = params["weight_ih"]          # (4H, I)
    whh = params["weight_hh"]          # (4H, H)
    I = wih.shape[1]

    def pad_gate_cols(w_t, rows, rows_p):
        # w_t: (rows, 4H) -> (rows_p, 4*Hp), padding each H-wide gate block.
        w4 = w_t.reshape(rows, 4, H)
        w4 = jnp.pad(w4, ((0, rows_p - rows), (0, 0), (0, Hp - H)))
        return w4.reshape(rows_p, 4 * Hp)

    wih_p = pad_gate_cols(wih.T, I, Ip)    # (Ip, 4Hp)
    whh_p = pad_gate_cols(whh.T, H, Hp)    # (Hp, 4Hp)
    w_cat = jnp.concatenate([wih_p, whh_p], axis=0).astype(compute_dtype)

    b = (params["bias_ih"] + params["bias_hh"]).reshape(4, H)
    b = jnp.pad(b, ((0, 0), (0, Hp - H))).reshape(1, 4 * Hp).astype(jnp.float32)
    return w_cat, b


def _gate_math(gates, cx, alpha, one_m_alpha, Hp):
    """Shared Alpha-LSTM gate math (f32)."""
    ingate = jax.nn.sigmoid(gates[:, 0 * Hp:1 * Hp])
    forgetgate = alpha * jax.nn.sigmoid(gates[:, 1 * Hp:2 * Hp]) + one_m_alpha
    cellgate = jnp.tanh(gates[:, 2 * Hp:3 * Hp])
    outgate = jax.nn.sigmoid(gates[:, 3 * Hp:4 * Hp])
    cy = forgetgate * cx + alpha * (ingate * cellgate)
    hy = outgate * jnp.tanh(cy)
    return hy, cy


# ----------------------------------------------------------------------------
# Single-step cell kernel  (matches Alpha_LSTMCell.forward)
# ----------------------------------------------------------------------------
def _alpha_lstm_cell_kernel(alpha_ref, xh_ref, w_ref, b_ref, cx_ref,
                            hy_ref, cy_ref):
    alpha = alpha_ref[0, 0]
    one_m_alpha = alpha_ref[0, 1]
    Hp = hy_ref.shape[1]

    # One fused matmul: (Bp, Ip+Hp) @ (Ip+Hp, 4Hp) -> f32 accumulate.
    gates = jnp.dot(xh_ref[...], w_ref[...],
                    preferred_element_type=jnp.float32) + b_ref[...]

    hy, cy = _gate_math(gates, cx_ref[...], alpha, one_m_alpha, Hp)
    hy_ref[...] = hy.astype(hy_ref.dtype)
    cy_ref[...] = cy.astype(cy_ref.dtype)


def alpha_lstm_cell(x, state, params, alpha=1.0, compute_dtype=jnp.float32):
    """Pallas implementation of Alpha_LSTMCell.forward (one timestep).

    x: (B, I), state=(hx, cx) each (B, H), params has weight_ih (4H, I),
    weight_hh (4H, H), bias_ih (4H,), bias_hh (4H,).  Returns (hy, (hy, cy)).
    """
    compute_dtype = jnp.dtype(compute_dtype)
    is_bf16 = compute_dtype == jnp.dtype(jnp.bfloat16)

    hx, cx = state
    B, I = x.shape
    H = hx.shape[1]
    Bp = _round_up(B, 16 if is_bf16 else 8)
    Hp = _round_up(H, 128)
    Ip = _round_up(I, 128)

    w_cat, bias = _prep_fused_weights(params, H, Hp, Ip, compute_dtype)

    x_p = jnp.pad(x, ((0, Bp - B), (0, Ip - I))).astype(compute_dtype)
    hx_p = jnp.pad(hx, ((0, Bp - B), (0, Hp - H))).astype(compute_dtype)
    cx_p = jnp.pad(cx, ((0, Bp - B), (0, Hp - H))).astype(jnp.float32)
    xh = jnp.concatenate([x_p, hx_p], axis=1)                 # (Bp, Ip+Hp)

    alpha_arr = jnp.array([[alpha, 1.0 - alpha]], jnp.float32)  # (1, 2)

    vmem = pl.BlockSpec(memory_space=pltpu.MemorySpace.VMEM)
    smem = pl.BlockSpec(memory_space=pltpu.MemorySpace.SMEM)

    hy_p, cy_p = pl.pallas_call(
        _alpha_lstm_cell_kernel,
        out_shape=(jax.ShapeDtypeStruct((Bp, Hp), jnp.float32),
                   jax.ShapeDtypeStruct((Bp, Hp), jnp.float32)),
        in_specs=[smem, vmem, vmem, vmem, vmem],
        out_specs=(vmem, vmem),
    )(alpha_arr, xh, w_cat, bias, cx_p)

    hy = hy_p[:B, :H].astype(x.dtype)
    cy = cy_p[:B, :H].astype(x.dtype)
    return hy, (hy, cy)


# ----------------------------------------------------------------------------
# Fused-over-time kernel: weights resident in VMEM across all T steps.
# ----------------------------------------------------------------------------
def _alpha_lstm_seq_kernel(alpha_ref, x_ref, w_ref, b_ref, h0_ref, c0_ref,
                           hs_ref, cy_ref, h_c, c_c, xh_c):
    t = pl.program_id(0)
    alpha = alpha_ref[0, 0]
    one_m_alpha = alpha_ref[0, 1]
    Ip = x_ref.shape[1]
    Hp = h_c.shape[1]

    @pl.when(t == 0)
    def _():
        h_c[...] = h0_ref[...]
        c_c[...] = c0_ref[...]

    # Stage [x_t ; h_{t-1}] so the recurrence uses ONE fused MXU matmul.
    xh_c[:, :Ip] = x_ref[...]
    xh_c[:, Ip:] = h_c[...].astype(xh_c.dtype)

    gates = jnp.dot(xh_c[...], w_ref[...],
                    preferred_element_type=jnp.float32) + b_ref[...]

    hy, cy = _gate_math(gates, c_c[...], alpha, one_m_alpha, Hp)

    h_c[...] = hy
    c_c[...] = cy
    hs_ref[...] = hy.astype(hs_ref.dtype)

    # Final-cell output: VMEM-resident (constant index map), write once.
    @pl.when(t == pl.num_programs(0) - 1)
    def _():
        cy_ref[...] = cy.astype(cy_ref.dtype)


def alpha_lstm_sequence(xs, state, params, alpha=1.0,
                        compute_dtype=jnp.float32):
    """Run Alpha_LSTMCell over a sequence xs: (T, B, I) in ONE pallas_call.

    The fused weight matrix + bias are DMA'd once and stay VMEM-resident over
    the (sequential) T grid axis; hx/cx are carried in VMEM scratch.
    Returns (hs (T, B, H), (h_T, c_T)).
    """
    compute_dtype = jnp.dtype(compute_dtype)
    is_bf16 = compute_dtype == jnp.dtype(jnp.bfloat16)

    hx, cx = state
    T, B, I = xs.shape
    H = hx.shape[1]
    Bp = _round_up(B, 16 if is_bf16 else 8)
    Hp = _round_up(H, 128)
    Ip = _round_up(I, 128)

    w_cat, bias = _prep_fused_weights(params, H, Hp, Ip, compute_dtype)

    xs_p = jnp.pad(xs, ((0, 0), (0, Bp - B), (0, Ip - I))).astype(compute_dtype)
    h0 = jnp.pad(hx, ((0, Bp - B), (0, Hp - H))).astype(jnp.float32)
    c0 = jnp.pad(cx, ((0, Bp - B), (0, Hp - H))).astype(jnp.float32)
    alpha_arr = jnp.array([[alpha, 1.0 - alpha]], jnp.float32)   # (1, 2)

    grid_spec = pltpu.PrefetchScalarGridSpec(
        num_scalar_prefetch=0,
        grid=(T,),
        in_specs=[
            # alpha / (1-alpha) scalars in SMEM (constant across the grid).
            pl.BlockSpec((1, 2), lambda t: (0, 0),
                         memory_space=pltpu.MemorySpace.SMEM),
            # Per-step input slice (leading T dim squeezed away).
            pl.BlockSpec((None, Bp, Ip), lambda t: (t, 0, 0)),
            # Fused weights + bias: constant block index -> VMEM-resident.
            pl.BlockSpec((Ip + Hp, 4 * Hp), lambda t: (0, 0)),
            pl.BlockSpec((1, 4 * Hp), lambda t: (0, 0)),
            # Initial state (read only at t == 0).
            pl.BlockSpec((Bp, Hp), lambda t: (0, 0)),
            pl.BlockSpec((Bp, Hp), lambda t: (0, 0)),
        ],
        out_specs=(
            pl.BlockSpec((None, Bp, Hp), lambda t: (t, 0, 0)),   # h_t per step
            pl.BlockSpec((Bp, Hp), lambda t: (0, 0)),            # final c
        ),
        scratch_shapes=[
            pltpu.VMEM((Bp, Hp), jnp.float32),              # h carry (f32)
            pltpu.VMEM((Bp, Hp), jnp.float32),              # c carry (f32)
            pltpu.VMEM((Bp, Ip + Hp), compute_dtype),       # [x ; h] staging
        ],
    )

    hs_p, cy_p = pl.pallas_call(
        _alpha_lstm_seq_kernel,
        out_shape=(jax.ShapeDtypeStruct((T, Bp, Hp), jnp.float32),
                   jax.ShapeDtypeStruct((Bp, Hp), jnp.float32)),
        grid_spec=grid_spec,
        compiler_params=pltpu.CompilerParams(
            dimension_semantics=("arbitrary",)),   # recurrence is sequential
    )(alpha_arr, xs_p, w_cat, bias, h0, c0)

    hs = hs_p[:, :B, :H].astype(xs.dtype)
    hy = hs[-1]
    cy = cy_p[:B, :H].astype(xs.dtype)
    return hs, (hy, cy)


# ----------------------------------------------------------------------------
# Pure-JAX references
# ----------------------------------------------------------------------------
def _reference_cell(x, state, params, alpha=1.0):
    hx, cx = state
    gates = (x @ params["weight_ih"].T + params["bias_ih"]
             + hx @ params["weight_hh"].T + params["bias_hh"])
    i, f, g, o = jnp.split(gates, 4, axis=1)
    i = jax.nn.sigmoid(i)
    f = alpha * jax.nn.sigmoid(f) + (1 - alpha)
    g = jnp.tanh(g)
    o = jax.nn.sigmoid(o)
    cy = f * cx + alpha * (i * g)
    hy = o * jnp.tanh(cy)
    return hy, (hy, cy)


def _reference_sequence(xs, state, params, alpha=1.0):
    hs = []
    for t in range(xs.shape[0]):
        hy, state = _reference_cell(xs[t], state, params, alpha)
        hs.append(hy)
    return jnp.stack(hs), state


# ----------------------------------------------------------------------------
# Test
# ----------------------------------------------------------------------------
if __name__ == "__main__":
    B, INPUT_SIZE, HIDDEN_SIZE, T = 2, 16, 32, 8
    ALPHA = 0.75

    key = jax.random.PRNGKey(0)
    k = jax.random.split(key, 8)
    params = {
        "weight_ih": jax.random.normal(k[0], (4 * HIDDEN_SIZE, INPUT_SIZE), jnp.float32),
        "weight_hh": jax.random.normal(k[1], (4 * HIDDEN_SIZE, HIDDEN_SIZE), jnp.float32),
        "bias_ih":   jax.random.normal(k[2], (4 * HIDDEN_SIZE,), jnp.float32),
        "bias_hh":   jax.random.normal(k[3], (4 * HIDDEN_SIZE,), jnp.float32),
    }
    x  = jax.random.normal(k[4], (B, INPUT_SIZE), jnp.float32)
    hx = jax.random.normal(k[5], (B, HIDDEN_SIZE), jnp.float32)
    cx = jax.random.normal(k[6], (B, HIDDEN_SIZE), jnp.float32)
    xs = jax.random.normal(k[7], (T, B, INPUT_SIZE), jnp.float32)

    # --- single-step cell, f32 MXU path (strict check) ---
    hy, (_, cy) = alpha_lstm_cell(x, (hx, cx), params, alpha=ALPHA)
    jax.block_until_ready((hy, cy))
    hy_r, (_, cy_r) = _reference_cell(x, (hx, cx), params, alpha=ALPHA)
    assert jnp.allclose(hy, hy_r, atol=2e-4, rtol=2e-4)
    assert jnp.allclose(cy, cy_r, atol=2e-4, rtol=2e-4)

    # --- single-step cell, bf16 MXU inputs with f32 accumulation ---
    hy_b, (_, cy_b) = alpha_lstm_cell(x, (hx, cx), params, alpha=ALPHA,
                                      compute_dtype=jnp.bfloat16)
    jax.block_until_ready((hy_b, cy_b))
    assert float(jnp.max(jnp.abs(hy_b - hy_r))) < 0.15
    assert float(jnp.max(jnp.abs(cy_b - cy_r))) < 0.15

    # --- fused sequence: weights VMEM-resident over T steps, f32 path ---
    hs, (hT, cT) = alpha_lstm_sequence(xs, (hx, cx), params, alpha=ALPHA)
    jax.block_until_ready((hs, hT, cT))
    hs_r, (hT_r, cT_r) = _reference_sequence(xs, (hx, cx), params, alpha=ALPHA)
    assert jnp.allclose(hs, hs_r, atol=1e-3, rtol=1e-3)
    assert jnp.allclose(hT, hT_r, atol=1e-3, rtol=1e-3)
    assert jnp.allclose(cT, cT_r, atol=1e-3, rtol=1e-3)

    # --- fused sequence, bf16 MXU path (loose sanity bound) ---
    hs_b, (hT_b, cT_b) = alpha_lstm_sequence(xs, (hx, cx), params, alpha=ALPHA,
                                             compute_dtype=jnp.bfloat16)
    jax.block_until_ready((hs_b, cT_b))
    assert float(jnp.max(jnp.abs(hs_b - hs_r))) < 0.5

    print("KERNEL_OK")
</pallas_src>

<mosaic_0001>
module attributes {stable_mosaic.version = 11 : i64} {
  func.func @_alpha_lstm_cell_kernel(%arg0: memref<1x2xf32, #tpu.memory_space<smem>>, %arg1: memref<8x256xf32, #tpu.memory_space<vmem>>, %arg2: memref<256x512xf32, #tpu.memory_space<vmem>>, %arg3: memref<1x512xf32, #tpu.memory_space<vmem>>, %arg4: memref<8x128xf32, #tpu.memory_space<vmem>>, %arg5: memref<8x128xf32, #tpu.memory_space<vmem>>, %arg6: memref<8x128xf32, #tpu.memory_space<vmem>>) attributes {dimension_semantics = [], scalar_prefetch = 0 : i64, scratch_operands = 0 : i64, tpu.core_type = #tpu.core_type<tc>} {
    %c0 = arith.constant 0 : index
    %c0_0 = arith.constant 0 : index
    %0 = memref.load %arg0[%c0, %c0_0] : memref<1x2xf32, #tpu.memory_space<smem>>
    %c0_1 = arith.constant 0 : index
    %c1 = arith.constant 1 : index
    %1 = memref.load %arg0[%c0_1, %c1] : memref<1x2xf32, #tpu.memory_space<smem>>
    %c0_2 = arith.constant 0 : index
    %c0_3 = arith.constant 0 : index
    %2 = vector.load %arg1[%c0_2, %c0_3] : memref<8x256xf32, #tpu.memory_space<vmem>>, vector<8x256xf32>
    %c0_4 = arith.constant 0 : index
    %c0_5 = arith.constant 0 : index
    %3 = vector.load %arg2[%c0_4, %c0_5] : memref<256x512xf32, #tpu.memory_space<vmem>>, vector<256x512xf32>
    %cst = arith.constant dense<0.000000e+00> : vector<8x512xf32>
    %4 = tpu.matmul %2, %3, %cst {dimension_numbers = #tpu.dot_dimension_numbers<[1], [0], [0], [1], [0, 0, 1, 1], [], []>} : vector<8x256xf32>, vector<256x512xf32>, vector<8x512xf32> -> vector<8x512xf32>
    %c0_6 = arith.constant 0 : index
    %c0_7 = arith.constant 0 : index
    %5 = vector.load %arg3[%c0_6, %c0_7] : memref<1x512xf32, #tpu.memory_space<vmem>>, vector<1x512xf32>
    %6 = vector.broadcast %5 : vector<1x512xf32> to vector<8x512xf32>
    %7 = arith.addf %4, %6 : vector<8x512xf32>
    %c0_8 = arith.constant 0 : index
    %c0_9 = arith.constant 0 : index
    %8 = vector.load %arg4[%c0_8, %c0_9] : memref<8x128xf32, #tpu.memory_space<vmem>>, vector<8x128xf32>
    %9 = vector.extract_strided_slice %7 {offsets = [0, 0], sizes = [8, 128], strides = [1, 1]} : vector<8x512xf32> to vector<8x128xf32>
    %10 = arith.negf %9 : vector<8x128xf32>
    %11 = math.exp %10 : vector<8x128xf32>
    %cst_10 = arith.constant 1.000000e+00 : f32
    %12 = vector.broadcast %cst_10 : f32 to vector<8x128xf32>
    %13 = arith.addf %12, %11 : vector<8x128xf32>
    %14 = arith.divf %12, %13 : vector<8x128xf32>
    %15 = vector.extract_strided_slice %7 {offsets = [0, 128], sizes = [8, 128], strides = [1, 1]} : vector<8x512xf32> to vector<8x128xf32>
    %16 = arith.negf %15 : vector<8x128xf32>
    %17 = math.exp %16 : vector<8x128xf32>
    %cst_11 = arith.constant 1.000000e+00 : f32
    %18 = vector.broadcast %cst_11 : f32 to vector<8x128xf32>
    %19 = arith.addf %18, %17 : vector<8x128xf32>
    %20 = arith.divf %18, %19 : vector<8x128xf32>
    %21 = vector.broadcast %0 : f32 to vector<8x128xf32>
    %22 = arith.mulf %21, %20 : vector<8x128xf32>
    %23 = vector.broadcast %1 : f32 to vector<8x128xf32>
    %24 = arith.addf %22, %23 : vector<8x128xf32>
    %25 = vector.extract_strided_slice %7 {offsets = [0, 256], sizes = [8, 128], strides = [1, 1]} : vector<8x512xf32> to vector<8x128xf32>
    %26 = math.tanh %25 : vector<8x128xf32>
    %27 = vector.extract_strided_slice %7 {offsets = [0, 384], sizes = [8, 128], strides = [1, 1]} : vector<8x512xf32> to vector<8x128xf32>
    %28 = arith.negf %27 : vector<8x128xf32>
    %29 = math.exp %28 : vector<8x128xf32>
    %cst_12 = arith.constant 1.000000e+00 : f32
    %30 = vector.broadcast %cst_12 : f32 to vector<8x128xf32>
    %31 = arith.addf %30, %29 : vector<8x128xf32>
    %32 = arith.divf %30, %31 : vector<8x128xf32>
    %33 = arith.mulf %24, %8 : vector<8x128xf32>
    %34 = arith.mulf %14, %26 : vector<8x128xf32>
    %35 = vector.broadcast %0 : f32 to vector<8x128xf32>
    %36 = arith.mulf %35, %34 : vector<8x128xf32>
    %37 = arith.addf %33, %36 : vector<8x128xf32>
    %38 = math.tanh %37 : vector<8x128xf32>
    %39 = arith.mulf %32, %38 : vector<8x128xf32>
    %c0_13 = arith.constant 0 : index
    %c0_14 = arith.constant 0 : index
    %40 = vector.load %arg5[%c0_13, %c0_14] : memref<8x128xf32, #tpu.memory_space<vmem>>, vector<8x128xf32>
    tpu.vector_store %arg5[%c0_13, %c0_14], %39 {strides = array<i32>} : memref<8x128xf32, #tpu.memory_space<vmem>>, vector<8x128xf32>,
    %c0_15 = arith.constant 0 : index
    %c0_16 = arith.constant 0 : index
    %41 = vector.load %arg6[%c0_15, %c0_16] : memref<8x128xf32, #tpu.memory_space<vmem>>, vector<8x128xf32>
    tpu.vector_store %arg6[%c0_15, %c0_16], %37 {strides = array<i32>} : memref<8x128xf32, #tpu.memory_space<vmem>>, vector<8x128xf32>,
    return
  }
}

</mosaic_0001>

<bundles_post_ra>
// kernel: tpu_custom_call.1
= control target key start
LH: loop header
LB: loop body
LE: loop exit
PB: predicated region body
PF: predicated region fallthrough
CT: control target
= control target key end

     0   :  { %12 = vsyncpa [#allocation5], 0  ;;  %s645_s0 = inlined_call_operand.hbm [shape: f32[1,2], index: 0, kind: input, shape index: {}]   ;;  %s646_s1 = inlined_call_operand.hbm [shape: f32[8,256], index: 1, kind: input, shape index: {}]   ;;  %s647_s2 = inlined_call_operand.hbm [shape: f32[256,512], index: 2, kind: input, shape index: {}]   ;;  %s648_s3 = inlined_call_operand.vmem [shape: f32[1,512], index: 3, kind: input, shape index: {}]   ;;  %s649_s4 = inlined_call_operand.hbm [shape: f32[8,128], index: 4, kind: input, shape index: {}]   ;;  %s650_s5 = inlined_call_operand.hbm [shape: f32[8,128], index: 5, kind: output, shape index: {0}]   ;;  %s651_s6 = inlined_call_operand.hbm [shape: f32[8,128], index: 6, kind: output, shape index: {1}]  }
   0x1   :  { %13 = vsyncpa [#allocation3], 0 }
   0x2   :  { %14 = vsyncpa [#allocation8], 0 }
   0x3   :  { %15 = vsyncpa [#allocation4], 0 }
   0x4   :  { %16 = vsyncpa [#allocation12], 0  ;;  %s577_s21 = smov [#allocation7]  }
   0x5   :  { %s40_s22 = sshll.u32 %s577_s21, 4  ;;  %s41_s22 = int_to_ptr.vmem [resolvable:$true] %s40_s22 }
   0x6   :  { %s467_s23 = scalar_lea.vmem %s41_s22, 16384  ;;  %p472_p1 = scmp.lt.s32.totalorder %s41_s22, %s41_s22 }
   0x7   :  { %p468_p0 = scmp.ne.s32.totalorder %s41_s22, %s467_s23  ;;  %p473_p2 = scmp.lt.s32.totalorder %s467_s23, %s467_s23 }
   0x9   :  { %p474_p3 = por %p473_p2, %p472_p1 }
   0xb   :  { %p475_p4 = pnand %p474_p3, %p468_p0 }
   0xd   :  { %478 = shalt.err (!%p475_p4)
}
   0xe   :  { %s578_s24 = smov 512   ;;  %s579_s25 = smov 32  }
   0xf   :  { %46 = dma.hbm_to_vmem [thread:$0]  %s647_s2, 16384, %s41_s22, [#allocation8], %s578_s24, %s578_s24, %s579_s25  }
  0x10   :  { %s580_s28 = smov [#allocation2]   ;;  %s581_s7 = smov [#allocation6]  }
  0x11   :  { %24 = dma.hbm_to_smem %s645_s0, 16, %s580_s28, [#allocation5]  }
  0x12   :  { %s31_s8 = sshll.u32 %s581_s7, 4  ;;  %s582_s9 = smov [#allocation9]   ;;  %s32_s8 = int_to_ptr.vmem [resolvable:$true] %s31_s8 }
  0x13   :  { %s55_s10 = sshll.u32 %s582_s9, 4  ;;  %s495_s11 = scalar_lea.vmem %s32_s8, 256  ;;  %s56_s10 = int_to_ptr.vmem [resolvable:$true] %s55_s10 }
  0x14   :  { %p496_p5 = scmp.ne.s32.totalorder %s32_s8, %s495_s11  ;;  %p500_p6 = scmp.lt.s32.totalorder %s32_s8, %s32_s8 }
  0x15   :  { %p501_p7 = scmp.lt.s32.totalorder %s495_s11, %s495_s11 }
  0x17   :  { %p502_p8 = por %p501_p7, %p500_p6 }
  0x19   :  { %p503_p9 = pnand %p502_p8, %p496_p5 }
  0x1b   :  { %506 = shalt.err (!%p503_p9)
}
  0x1c   :  { %34 = dma.hbm_to_vmem [thread:$0]  %s646_s1, 256, %s32_s8, [#allocation3]  }
  0x1d   :  { %s515_s13 = scalar_lea.vmem %s56_s10, 128  ;;  %p520_p11 = scmp.lt.s32.totalorder %s56_s10, %s56_s10 }
  0x1e   :  { %p516_p10 = scmp.ne.s32.totalorder %s56_s10, %s515_s13  ;;  %p521_p12 = scmp.lt.s32.totalorder %s515_s13, %s515_s13 }
  0x20   :  { %p522_p13 = por %p521_p12, %p520_p11 }
  0x22   :  { %p523_p0 = pnand %p522_p13, %p516_p10 }
  0x24   :  { %526 = shalt.err (!%p523_p0)
}
  0x25   :  { %58 = dma.hbm_to_vmem [thread:$0]  %s649_s4, 128, %s56_s10, [#allocation8]  }
  0x26   :  { %567 = dma.done.wait [#allocation5], 16  }
  0x27   :  { %568 = vsyncadd [#allocation5], 4294967280 }
  0x28   :  { %569 = dma.done.wait [#allocation3], 256  }
  0x29   :  { %570 = vsyncadd [#allocation3], 4294967040 }
  0x2a   :  { %571 = dma.done.wait [#allocation8], 16512  }
  0x2b   :  { %572 = vsyncadd [#allocation8], 4294950784 }
  0x2c   :  { %71 = sfence }
  0x2d   :  { %v137_v0 = vld [vmem:[#allocation7 + $0x1e8] sm:$0xff]  ;;  %v136_v1 = vld [vmem:[#allocation7 + $0x1e0] sm:$0xff]  ;;  %v139_v9 = vld [vmem:[#allocation7 + $0x1f8] sm:$0xff]  ;;  %s431_s15 = sld [smem:[#allocation2 + $0x1]]  ;;  %s583_s16 = smov [#allocation11]  }
  0x2e   :  { %v133_v2 = vld [vmem:[#allocation7 + $0x1c8] sm:$0xff]  ;;  %226 = vmatprep.subr.mxu0 %v137_v0  ;;  %v132_v3 = vld [vmem:[#allocation7 + $0x1c0] sm:$0xff]  ;;  %297 = vmatprep.subr.mxu1 %v139_v9  ;;  %v138_v11 = vld [vmem:[#allocation7 + $0x1f0] sm:$0xff]  ;;  %s416_s17 = sshll.u32 %s583_s16, 4  ;;  %s417_s17 = int_to_ptr.vmem [resolvable:$true] %s416_s17 }
  0x2f   :  { %227 = vmatpush1.msra.mxu0 %v136_v1  ;;  %v129_v4 = vld [vmem:[#allocation7 + $0x1a8] sm:$0xff]  ;;  %v128_v5 = vld [vmem:[#allocation7 + $0x1a0] sm:$0xff]  ;;  %v135_v12 = vld [vmem:[#allocation7 + $0x1d8] sm:$0xff]  ;;  %298 = vmatpush1.msra.mxu1 %v138_v11  ;;  %s527_s18 = scalar_lea.vmem %s417_s17, 128  ;;  %p532_p2 = scmp.lt.s32.totalorder %s417_s17, %s417_s17 }
  0x30   :  { %228 = vmatprep.subr.mxu0 %v133_v2  ;;  %v125_v6 = vld [vmem:[#allocation7 + $0x188] sm:$0xff]  ;;  %v124_v7 = vld [vmem:[#allocation7 + $0x180] sm:$0xff]  ;;  %v134_v14 = vld [vmem:[#allocation7 + $0x1d0] sm:$0xff]  ;;  %299 = vmatprep.subr.mxu1 %v135_v12  ;;  %p528_p1 = scmp.ne.s32.totalorder %s417_s17, %s527_s18  ;;  %p533_p3 = scmp.lt.s32.totalorder %s527_s18, %s527_s18 }
  0x31   :  { %229 = vmatpush1.msra.mxu0 %v132_v3  ;;  %v121_v8 = vld [vmem:[#allocation7 + $0x168] sm:$0xff]  ;;  %v120_v10 = vld [vmem:[#allocation7 + $0x160] sm:$0xff]  ;;  %v131_v16 = vld [vmem:[#allocation7 + $0x1b8] sm:$0xff]  ;;  %300 = vmatpush1.msra.mxu1 %v134_v14 }
  0x32   :  { %230 = vmatprep.subr.mxu0 %v129_v4  ;;  %v117_v13 = vld [vmem:[#allocation7 + $0x148] sm:$0xff]  ;;  %v116_v15 = vld [vmem:[#allocation7 + $0x140] sm:$0xff]  ;;  %v130_v17 = vld [vmem:[#allocation7 + $0x1b0] sm:$0xff]  ;;  %301 = vmatprep.subr.mxu1 %v131_v16  ;;  %p534_p4 = por %p533_p3, %p532_p2 }
  0x33   :  { %231 = vmatpush1.msra.mxu0 %v128_v5  ;;  %v113_v18 = vld [vmem:[#allocation7 + $0x128] sm:$0xff]  ;;  %v127_v19 = vld [vmem:[#allocation7 + $0x198] sm:$0xff]  ;;  %v112_v20 = vld [vmem:[#allocation7 + $0x120] sm:$0xff]  ;;  %302 = vmatpush1.msra.mxu1 %v130_v17 }
  0x34   :  { %232 = vmatprep.subr.mxu0 %v125_v6  ;;  %v126_v21 = vld [vmem:[#allocation7 + $0x190] sm:$0xff]  ;;  %v109_v22 = vld [vmem:[#allocation7 + $0x108] sm:$0xff]  ;;  %v123_v23 = vld [vmem:[#allocation7 + $0x178] sm:$0xff]  ;;  %303 = vmatprep.subr.mxu1 %v127_v19  ;;  %p535_p5 = pnand %p534_p4, %p528_p1 }
  0x35   :  { %233 = vmatpush1.msra.mxu0 %v124_v7  ;;  %v108_v24 = vld [vmem:[#allocation7 + $0x100] sm:$0xff]  ;;  %v122_v25 = vld [vmem:[#allocation7 + $0x170] sm:$0xff]  ;;  %v105_v26 = vld [vmem:[#allocation7 + $0xe8] sm:$0xff]  ;;  %304 = vmatpush1.msra.mxu1 %v126_v21 }
  0x36   :  { %234 = vmatprep.subr.mxu0 %v121_v8  ;;  %v119_v27 = vld [vmem:[#allocation7 + $0x158] sm:$0xff]  ;;  %v104_v28 = vld [vmem:[#allocation7 + $0xe0] sm:$0xff]  ;;  %305 = vmatprep.subr.mxu1 %v123_v23  ;;  %v118_v29 = vld [vmem:[#allocation7 + $0x150] sm:$0xff] }
  0x37   :  { %235 = vmatpush1.msra.mxu0 %v120_v10  ;;  %v101_v30 = vld [vmem:[#allocation7 + $0xc8] sm:$0xff]  ;;  %306 = vmatpush1.msra.mxu1 %v122_v25  ;;  %v115_v31 = vld [vmem:[#allocation7 + $0x138] sm:$0xff]  ;;  %v100_v32 = vld [vmem:[#allocation7 + $0xc0] sm:$0xff] }
  0x38   :  { %236 = vmatprep.subr.mxu0 %v117_v13  ;;  %307 = vmatprep.subr.mxu1 %v119_v27  ;;  %v114_v33 = vld [vmem:[#allocation7 + $0x130] sm:$0xff]  ;;  %v97_v34 = vld [vmem:[#allocation7 + $0xa8] sm:$0xff]  ;;  %v111_v35 = vld [vmem:[#allocation7 + $0x118] sm:$0xff] }
  0x39   :  { %237 = vmatpush1.msra.mxu0 %v116_v15  ;;  %308 = vmatpush1.msra.mxu1 %v118_v29  ;;  %v96_v36 = vld [vmem:[#allocation7 + $0xa0] sm:$0xff]  ;;  %v110_v37 = vld [vmem:[#allocation7 + $0x110] sm:$0xff]  ;;  %v93_v38 = vld [vmem:[#allocation7 + $0x88] sm:$0xff] }
  0x3a   :  { %238 = vmatprep.subr.mxu0 %v113_v18  ;;  %309 = vmatprep.subr.mxu1 %v115_v31  ;;  %v107_v39 = vld [vmem:[#allocation7 + $0xf8] sm:$0xff]  ;;  %v92_v40 = vld [vmem:[#allocation7 + $0x80] sm:$0xff]  ;;  %v106_v41 = vld [vmem:[#allocation7 + $0xf0] sm:$0xff] }
  0x3b   :  { %239 = vmatpush1.msra.mxu0 %v112_v20  ;;  %310 = vmatpush1.msra.mxu1 %v114_v33  ;;  %v89_v42 = vld [vmem:[#allocation7 + $0x68] sm:$0xff]  ;;  %v103_v43 = vld [vmem:[#allocation7 + $0xd8] sm:$0xff]  ;;  %v88_v44 = vld [vmem:[#allocation7 + $0x60] sm:$0xff] }
  0x3c   :  { %240 = vmatprep.subr.mxu0 %v109_v22  ;;  %311 = vmatprep.subr.mxu1 %v111_v35  ;;  %v102_v45 = vld [vmem:[#allocation7 + $0xd0] sm:$0xff]  ;;  %v85_v46 = vld [vmem:[#allocation7 + $0x48] sm:$0xff]  ;;  %v99_v47 = vld [vmem:[#allocation7 + $0xb8] sm:$0xff] }
  0x3d   :  { %241 = vmatpush1.msra.mxu0 %v108_v24  ;;  %312 = vmatpush1.msra.mxu1 %v110_v37  ;;  %v84_v48 = vld [vmem:[#allocation7 + $0x40] sm:$0xff]  ;;  %v98_v49 = vld [vmem:[#allocation7 + $0xb0] sm:$0xff]  ;;  %v81_v50 = vld [vmem:[#allocation7 + $0x28] sm:$0xff] }
  0x3e   :  { %242 = vmatprep.subr.mxu0 %v105_v26  ;;  %313 = vmatprep.subr.mxu1 %v107_v39  ;;  %v95_v51 = vld [vmem:[#allocation7 + $0x98] sm:$0xff]  ;;  %v80_v52 = vld [vmem:[#allocation7 + $0x20] sm:$0xff]  ;;  %v94_v53 = vld [vmem:[#allocation7 + $0x90] sm:$0xff] }
  0x3f   :  { %243 = vmatpush1.msra.mxu0 %v104_v28  ;;  %314 = vmatpush1.msra.mxu1 %v106_v41  ;;  %v77_v54 = vld [vmem:[#allocation7 + $0x8] sm:$0xff]  ;;  %v91_v55 = vld [vmem:[#allocation7 + $0x78] sm:$0xff]  ;;  %v76_v56 = vld [vmem:[#allocation7] sm:$0xff] }
  0x40   :  { %244 = vmatprep.subr.mxu0 %v101_v30  ;;  %315 = vmatprep.subr.mxu1 %v103_v43  ;;  %v90_v57 = vld [vmem:[#allocation7 + $0x70] sm:$0xff]  ;;  %v201_v58 = vld [vmem:[#allocation7 + $0x3e8] sm:$0xff]  ;;  %v87_v59 = vld [vmem:[#allocation7 + $0x58] sm:$0xff] }
  0x41   :  { %245 = vmatpush1.msra.mxu0 %v100_v32  ;;  %316 = vmatpush1.msra.mxu1 %v102_v45  ;;  %v200_v60 = vld [vmem:[#allocation7 + $0x3e0] sm:$0xff]  ;;  %v86_v61 = vld [vmem:[#allocation7 + $0x50] sm:$0xff]  ;;  %v197_v62 = vld [vmem:[#allocation7 + $0x3c8] sm:$0xff] }
  0x42   :  { %246 = vmatprep.subr.mxu0 %v97_v34  ;;  %317 = vmatprep.subr.mxu1 %v99_v47  ;;  %v83_v63 = vld [vmem:[#allocation7 + $0x38] sm:$0xff]  ;;  %v196_v0 = vld [vmem:[#allocation7 + $0x3c0] sm:$0xff]  ;;  %v82_v1 = vld [vmem:[#allocation7 + $0x30] sm:$0xff] }
  0x43   :  { %247 = vmatpush1.msra.mxu0 %v96_v36  ;;  %318 = vmatpush1.msra.mxu1 %v98_v49  ;;  %v193_v2 = vld [vmem:[#allocation7 + $0x3a8] sm:$0xff]  ;;  %v79_v3 = vld [vmem:[#allocation7 + $0x18] sm:$0xff]  ;;  %v192_v4 = vld [vmem:[#allocation7 + $0x3a0] sm:$0xff] }
  0x44   :  { %248 = vmatprep.subr.mxu0 %v93_v38  ;;  %319 = vmatprep.subr.mxu1 %v95_v51  ;;  %v78_v5 = vld [vmem:[#allocation7 + $0x10] sm:$0xff]  ;;  %v189_v6 = vld [vmem:[#allocation7 + $0x388] sm:$0xff]  ;;  %v203_v7 = vld [vmem:[#allocation7 + $0x3f8] sm:$0xff] }
  0x45   :  { %249 = vmatpush1.msra.mxu0 %v92_v40  ;;  %320 = vmatpush1.msra.mxu1 %v94_v53  ;;  %v188_v8 = vld [vmem:[#allocation7 + $0x380] sm:$0xff]  ;;  %v202_v9 = vld [vmem:[#allocation7 + $0x3f0] sm:$0xff]  ;;  %v185_v10 = vld [vmem:[#allocation7 + $0x368] sm:$0xff] }
  0x46   :  { %250 = vmatprep.subr.mxu0 %v89_v42  ;;  %321 = vmatprep.subr.mxu1 %v91_v55  ;;  %v199_v11 = vld [vmem:[#allocation7 + $0x3d8] sm:$0xff]  ;;  %v184_v12 = vld [vmem:[#allocation7 + $0x360] sm:$0xff]  ;;  %v198_v13 = vld [vmem:[#allocation7 + $0x3d0] sm:$0xff] }
  0x47   :  { %251 = vmatpush1.msra.mxu0 %v88_v44  ;;  %322 = vmatpush1.msra.mxu1 %v90_v57  ;;  %v181_v14 = vld [vmem:[#allocation7 + $0x348] sm:$0xff]  ;;  %v195_v15 = vld [vmem:[#allocation7 + $0x3b8] sm:$0xff]  ;;  %v180_v16 = vld [vmem:[#allocation7 + $0x340] sm:$0xff] }
  0x48   :  { %252 = vmatprep.subr.mxu0 %v85_v46  ;;  %323 = vmatprep.subr.mxu1 %v87_v59  ;;  %v194_v17 = vld [vmem:[#allocation7 + $0x3b0] sm:$0xff]  ;;  %v177_v18 = vld [vmem:[#allocation7 + $0x328] sm:$0xff]  ;;  %v191_v19 = vld [vmem:[#allocation7 + $0x398] sm:$0xff] }
  0x49   :  { %253 = vmatpush1.msra.mxu0 %v84_v48  ;;  %324 = vmatpush1.msra.mxu1 %v86_v61  ;;  %v176_v20 = vld [vmem:[#allocation7 + $0x320] sm:$0xff]  ;;  %v190_v21 = vld [vmem:[#allocation7 + $0x390] sm:$0xff]  ;;  %v173_v22 = vld [vmem:[#allocation7 + $0x308] sm:$0xff] }
  0x4a   :  { %254 = vmatprep.subr.mxu0 %v81_v50  ;;  %325 = vmatprep.subr.mxu1 %v83_v63  ;;  %v187_v23 = vld [vmem:[#allocation7 + $0x378] sm:$0xff]  ;;  %v172_v24 = vld [vmem:[#allocation7 + $0x300] sm:$0xff]  ;;  %v186_v25 = vld [vmem:[#allocation7 + $0x370] sm:$0xff] }
  0x4b   :  { %255 = vmatpush1.msra.mxu0 %v80_v52  ;;  %326 = vmatpush1.msra.mxu1 %v82_v1  ;;  %v169_v26 = vld [vmem:[#allocation7 + $0x2e8] sm:$0xff]  ;;  %v183_v27 = vld [vmem:[#allocation7 + $0x358] sm:$0xff]  ;;  %v168_v28 = vld [vmem:[#allocation7 + $0x2e0] sm:$0xff] }
  0x4c   :  { %256 = vmatprep.subr.mxu0 %v77_v54  ;;  %327 = vmatprep.subr.mxu1 %v79_v3  ;;  %v182_v29 = vld [vmem:[#allocation7 + $0x350] sm:$0xff]  ;;  %v165_v30 = vld [vmem:[#allocation7 + $0x2c8] sm:$0xff]  ;;  %v179_v31 = vld [vmem:[#allocation7 + $0x338] sm:$0xff] }
  0x4d   :  { %257 = vmatpush1.msra.mxu0 %v76_v56  ;;  %328 = vmatpush1.msra.mxu1 %v78_v5  ;;  %v164_v32 = vld [vmem:[#allocation7 + $0x2c0] sm:$0xff]  ;;  %v632_v33 = vld [vmem:[#allocation6 + $0x8] sm:$0xff]  ;;  %v161_v34 = vld [vmem:[#allocation7 + $0x2a8] sm:$0xff] }
  0x4e   :  { %258 = vmatprep.subr.mxu0 %v201_v58  ;;  %329 = vmatprep.subr.mxu1 %v203_v7  ;;  %v178_v35 = vld [vmem:[#allocation7 + $0x330] sm:$0xff]  ;;  %v160_v36 = vld [vmem:[#allocation7 + $0x2a0] sm:$0xff]  ;;  %v175_v37 = vld [vmem:[#allocation7 + $0x318] sm:$0xff] }
  0x4f   :  { %259 = vmatpush2.msra.mxu0 %v200_v60  ;;  %330 = vmatpush2.msra.mxu1 %v202_v9  ;;  %v157_v38 = vld [vmem:[#allocation7 + $0x288] sm:$0xff]  ;;  %v174_v39 = vld [vmem:[#allocation7 + $0x310] sm:$0xff]  ;;  %v156_v40 = vld [vmem:[#allocation7 + $0x280] sm:$0xff] }
  0x50   :  { %260 = vmatprep.subr.mxu0 %v197_v62  ;;  %331 = vmatprep.subr.mxu1 %v199_v11  ;;  %v171_v41 = vld [vmem:[#allocation7 + $0x2f8] sm:$0xff]  ;;  %v153_v42 = vld [vmem:[#allocation7 + $0x268] sm:$0xff]  ;;  %v170_v43 = vld [vmem:[#allocation7 + $0x2f0] sm:$0xff] }
  0x51   :  { %261 = vmatpush2.msra.mxu0 %v196_v0  ;;  %332 = vmatpush2.msra.mxu1 %v198_v13  ;;  %v152_v44 = vld [vmem:[#allocation7 + $0x260] sm:$0xff]  ;;  %v167_v45 = vld [vmem:[#allocation7 + $0x2d8] sm:$0xff]  ;;  %v149_v46 = vld [vmem:[#allocation7 + $0x248] sm:$0xff] }
  0x52   :  { %262 = vmatprep.subr.mxu0 %v193_v2  ;;  %333 = vmatprep.subr.mxu1 %v195_v15  ;;  %v166_v47 = vld [vmem:[#allocation7 + $0x2d0] sm:$0xff]  ;;  %v148_v48 = vld [vmem:[#allocation7 + $0x240] sm:$0xff]  ;;  %v163_v49 = vld [vmem:[#allocation7 + $0x2b8] sm:$0xff]  ;;  %v206_v2 = vlaneseq }
  0x53   :  { %263 = vmatpush2.msra.mxu0 %v192_v4  ;;  %334 = vmatpush2.msra.mxu1 %v194_v17  ;;  %v145_v50 = vld [vmem:[#allocation7 + $0x228] sm:$0xff]  ;;  %v162_v51 = vld [vmem:[#allocation7 + $0x2b0] sm:$0xff]  ;;  %v144_v52 = vld [vmem:[#allocation7 + $0x220] sm:$0xff] }
  0x54   :  { %264 = vmatprep.subr.mxu0 %v189_v6  ;;  %335 = vmatprep.subr.mxu1 %v191_v19  ;;  %v159_v53 = vld [vmem:[#allocation7 + $0x298] sm:$0xff]  ;;  %v141_v54 = vld [vmem:[#allocation7 + $0x208] sm:$0xff]  ;;  %v158_v55 = vld [vmem:[#allocation7 + $0x290] sm:$0xff]  ;;  %v207_v3 = vshrl.u32 %v206_v2, 7 }
  0x55   :  { %265 = vmatpush2.msra.mxu0 %v188_v8  ;;  %336 = vmatpush2.msra.mxu1 %v190_v21  ;;  %v140_v56 = vld [vmem:[#allocation7 + $0x200] sm:$0xff]  ;;  %v155_v57 = vld [vmem:[#allocation7 + $0x278] sm:$0xff]  ;;  %v74_v58 = vld [vmem:[#allocation6] sm:$0xff] }
  0x56   :  { %266 = vmatprep.subr.mxu0 %v185_v10  ;;  %337 = vmatprep.subr.mxu1 %v187_v23  ;;  %v154_v59 = vld [vmem:[#allocation7 + $0x270] sm:$0xff]  ;;  %v151_v60 = vld [vmem:[#allocation7 + $0x258] sm:$0xff]  ;;  %v208_v4 = vsub.s32 0, %v207_v3  ;;  %v212_v6 = vsub.s32 1, %v207_v3  ;;  %v216_v15 = vsub.s32 2, %v207_v3 }
  0x57   :  { %267 = vmatpush2.msra.mxu0 %v184_v12  ;;  %338 = vmatpush2.msra.mxu1 %v186_v25  ;;  %v150_v61 = vld [vmem:[#allocation7 + $0x250] sm:$0xff]  ;;  %v147_v62 = vld [vmem:[#allocation7 + $0x238] sm:$0xff] }
  0x58   :  { %268 = vmatprep.subr.mxu0 %v181_v14  ;;  %339 = vmatprep.subr.mxu1 %v183_v27  ;;  %v146_v63 = vld [vmem:[#allocation7 + $0x230] sm:$0xff]  ;;  %v143_v0 = vld [vmem:[#allocation7 + $0x218] sm:$0xff] }
  0x59   :  { %269 = vmatpush2.msra.mxu0 %v180_v16  ;;  %340 = vmatpush2.msra.mxu1 %v182_v29  ;;  %v142_v1 = vld [vmem:[#allocation7 + $0x210] sm:$0xff]  ;;  %v220_v16 = vsub.s32 3, %v207_v3 }
  0x5a   :  { %270 = vmatprep.subr.mxu0 %v177_v18  ;;  %341 = vmatprep.subr.mxu1 %v179_v31  ;;  %v204_v5 = vld [vmem:[%s648_s3] sm:$0xf]  ;;  %s72_s3 = sld [smem:[#allocation2]] }
  0x5b   :  { %271 = vmatpush2.msra.mxu0 %v176_v20  ;;  %290 = vmatprep.mubr.f32.mxu0 %v632_v33  ;;  %v209_v7 = vrot.slane %v204_v5, %v208_v4  ;;  %v213_v8 = vrot.slane %v204_v5, %v212_v6  ;;  %v217_v18 = vrot.slane %v204_v5, %v216_v15 }
  0x5c   :  { %272 = vmatprep.subr.mxu0 %v173_v22  ;;  %342 = vmatpush2.msra.mxu1 %v178_v35  ;;  %v221_v19 = vrot.slane %v204_v5, %v220_v16 }
  0x5d   :  { %273 = vmatpush2.msra.mxu0 %v172_v24  ;;  %343 = vmatprep.subr.mxu1 %v175_v37 }
  0x5e   :  { %274 = vmatprep.subr.mxu0 %v169_v26  ;;  %344 = vmatpush2.msra.mxu1 %v174_v39 }
  0x5f   :  { %275 = vmatpush2.msra.mxu0 %v168_v28  ;;  %345 = vmatprep.subr.mxu1 %v171_v41 }
  0x60   :  { %276 = vmatprep.subr.mxu0 %v165_v30  ;;  %346 = vmatpush2.msra.mxu1 %v170_v43  ;;  %v381_v30 = vstv %s72_s3 }
  0x61   :  { %277 = vmatpush2.msra.mxu0 %v164_v32  ;;  %347 = vmatprep.subr.mxu1 %v167_v45  ;;  %v383_v32 = vstv %s431_s15 }
  0x62   :  { %278 = vmatprep.subr.mxu0 %v161_v34  ;;  %348 = vmatpush2.msra.mxu1 %v166_v47 }
  0x63   :  { %279 = vmatpush2.msra.mxu0 %v160_v36  ;;  %349 = vmatprep.subr.mxu1 %v163_v49  ;;  %v368_v36 = vld [vmem:[#allocation9] sm:$0xff] }
  0x64   :  { %280 = vmatprep.subr.mxu0 %v157_v38  ;;  %350 = vmatpush2.msra.mxu1 %v162_v51 }
  0x65   :  { %281 = vmatpush2.msra.mxu0 %v156_v40  ;;  %351 = vmatprep.subr.mxu1 %v159_v53 }
  0x66   :  { %282 = vmatprep.subr.mxu0 %v153_v42  ;;  %352 = vmatpush2.msra.mxu1 %v158_v55 }
  0x67   :  { %283 = vmatpush2.msra.mxu0 %v152_v44  ;;  %353 = vmatprep.subr.mxu1 %v155_v57 }
  0x68   :  { %284 = vmatprep.subr.mxu0 %v149_v46  ;;  %354 = vmatpush2.msra.mxu1 %v154_v59 }
  0x69   :  { %285 = vmatpush2.msra.mxu0 %v148_v48  ;;  %355 = vmatprep.subr.mxu1 %v151_v60 }
  0x6a   :  { %286 = vmatprep.subr.mxu0 %v145_v50  ;;  %361 = vmatprep.mubr.f32.mxu1 %v632_v33 }
  0x6b   :  { %287 = vmatpush2.msra.mxu0 %v144_v52  ;;  %356 = vmatpush2.msra.mxu1 %v150_v61 }
  0x6c   :  { %288 = vmatprep.subr.mxu0 %v141_v54  ;;  %357 = vmatprep.subr.mxu1 %v147_v62 }
  0x6d   :  { %289 = vmatpush2.msra.mxu0 %v140_v56  ;;  %358 = vmatpush2.msra.mxu1 %v146_v63 }
  0x6e   :  { %291 = vmatmul.mubr.f32.vlgmr.msra.gmra.mxu0 %v74_v58  ;;  %359 = vmatprep.subr.mxu1 %v143_v0 }
  0x6f   :  { %360 = vmatpush2.msra.mxu1 %v142_v1 }
  0x70   :  { %362 = vmatmul.mubr.f32.vlgmr.msra.gmra.mxu1 %v74_v58 }
 0x12e   :  { %v292_v9 = vpop.f32.mrf.mxu0 }
 0x12f   :  { %v293_v10 = vadd.f32 %v292_v9, %v209_v7 }
 0x130   :  { %v294_v11 = vpop.f32.mrf.mxu0  ;;  %v363_v17 = vpop.f32.mrf.mxu1 }
 0x131   :  { %v432_v12 = vmul.f32 -1.442695, %v293_v10  ;;  %v295_v13 = vadd.f32 %v294_v11, %v213_v8  ;;  %v364_v21 = vadd.f32 %v363_v17, %v217_v18 }
 0x132   :  { %v365_v20 = vpop.f32.mrf.mxu1 }
 0x133   :  { %443 = vpow2.f32 %v432_v12  ;;  %v433_v14 = vmul.f32 -1.442695, %v295_v13  ;;  %v366_v22 = vadd.f32 %v365_v20, %v221_v19 }
 0x135   :  { %445 = vpow2.f32 %v433_v14  ;;  %v434_v26 = vmul.f32 -1.442695, %v366_v22 }
 0x136   :  { %447 = vtanh.f32 %v364_v21 }
 0x140   :  { %v444_v23 = vpop.eup %443 }
 0x141   :  { %v372_v24 = vadd.f32 1.0, %v444_v23 }
 0x142   :  { %v446_v25 = vpop.eup %445 }
 0x143   :  { %449 = vrcp.f32 %v372_v24  ;;  %v378_v27 = vadd.f32 1.0, %v446_v25  ;;  %v448_v28 = vpop.eup %447 }
 0x145   :  { %451 = vrcp.f32 %v378_v27 }
 0x146   :  { %453 = vpow2.f32 %v434_v26 }
 0x150   :  { %v450_v29 = vpop.eup %449 }
 0x151   :  { %v393_v35 = vmul.f32 %v450_v29, %v448_v28 }
 0x152   :  { %v452_v31 = vpop.eup %451 }
 0x153   :  { %v454_v33 = vpop.eup %453  ;;  %v382_v34 = vmul.f32 %v452_v31, %v381_v30  ;;  %v394_v39 = vmul.f32 %v393_v35, %v381_v30 }
 0x154   :  { %v389_v38 = vadd.f32 1.0, %v454_v33 }
 0x155   :  { %v384_v37 = vadd.f32 %v383_v32, %v382_v34 }
 0x156   :  { %455 = vrcp.f32 %v389_v38 }
 0x157   :  { %v392_v40 = vmul.f32 %v384_v37, %v368_v36 }
 0x159   :  { %v395_v41 = vadd.f32 %v394_v39, %v392_v40 }
 0x15b   :  { %457 = vtanh.f32 %v395_v41  ;;  %399 = vst [vmem:[#allocation11] sm:$0xff] %v395_v41 }
 0x15c   :  { %538 = shalt.err (!%p535_p5)
}
 0x15d   :  { %419 = dma.vmem_to_hbm [thread:$0]  %s417_s17, 128, %s651_s6, [#allocation12]  }
 0x15e   :  { %s584_s21 = smov [#allocation10]  }
 0x15f   :  { %s406_s22 = sshll.u32 %s584_s21, 4  ;;  %s407_s22 = int_to_ptr.vmem [resolvable:$true] %s406_s22 }
 0x160   :  { %s547_s23 = scalar_lea.vmem %s407_s22, 128  ;;  %p552_p7 = scmp.lt.s32.totalorder %s407_s22, %s407_s22 }
 0x161   :  { %p548_p6 = scmp.ne.s32.totalorder %s407_s22, %s547_s23  ;;  %p553_p8 = scmp.lt.s32.totalorder %s547_s23, %s547_s23 }
 0x163   :  { %v456_v42 = vpop.eup %455  ;;  %p554_p9 = por %p553_p8, %p552_p7 }
 0x165   :  { %p555_p10 = pnand %p554_p9, %p548_p6 }
 0x168   :  { %v458_v43 = vpop.eup %457 }
 0x169   :  { %v397_v44 = vmul.f32 %v458_v43, %v456_v42 }
 0x16b   :  { %398 = vst [vmem:[#allocation10] sm:$0xff] %v397_v44 }
 0x16c   :  { %558 = shalt.err (!%p555_p10)
}
 0x16d   :  { %409 = dma.vmem_to_hbm [thread:$0]  %s407_s22, 128, %s650_s5, [#allocation4]  }
 0x16e   :  { %573 = dma.done.wait [#allocation4], 128  }
 0x16f   :  { %574 = vsyncadd [#allocation4], 4294967168 }
 0x170   :  { %575 = dma.done.wait [#allocation12], 128  }
 0x171   :  { %576 = vsyncadd [#allocation12], 4294967168 }
 0x172   :  { %426 = vsyncpa [#allocation3], 1 }
 0x173   :  { %427 = vsyncpa [#allocation8], 1 }
 0x174   :  { %428 = vsyncpa [#allocation4], 1 }
 0x175   :  { %429 = vsyncpa [#allocation12], 1 }
 0x176   :  { %430 = vsyncpa [#allocation5], 1 }

</bundles_post_ra>
